<compile_context>
chip_gen: v6e
topology: v6e:2x2x1
jax: 0.10.0
libtpu: 0.0.40
codegen_flags: <defaults>
</compile_context>

<pallas_src>
import functools

import jax
import jax.numpy as jnp
from jax.experimental import pallas as pl
from jax.experimental.pallas import tpu as pltpu


LANE = 128


def _round_up(n, m):
    return ((n + m - 1) // m) * m


def _pad2(x, shape):
    pads = [(0, t - s) for s, t in zip(x.shape, shape)]
    return jnp.pad(x, pads) if any(p for _, p in pads) else x


def _const_spec(block_shape):
    """BlockSpec for a grid-invariant block (constant index_map).

    Single-buffered (pl.Buffered(1)) so it is not needlessly double-buffered;
    falls back to the default if this Pallas version rejects the kwarg.
    """
    idx = lambda i, k: (0, 0)
    try:
        return pl.BlockSpec(block_shape, idx, pipeline_mode=pl.Buffered(1))
    except (TypeError, ValueError):
        return pl.BlockSpec(block_shape, idx)


def _multimodal_kernel(x_im_ref, x_tab_ref,
                       w_im_ref, b_im_ref,
                       w_tab_ref, b_tab_ref,
                       w_head_ref, b_head_ref,
                       out_ref, acc_ref, *, d_im_pad):
    k = pl.program_id(1)
    nk = pl.num_programs(1)

    @pl.when(k == 0)
    def _():
        # Fold the imaging bias into the accumulator init (instead of zeros);
        # the tabular half is fully overwritten in the epilogue, no init needed.
        acc_ref[:, :d_im_pad] = jnp.broadcast_to(
            b_im_ref[...], (acc_ref.shape[0], d_im_pad)).astype(jnp.float32)

    # Imaging encoder (stand-in: flatten outside + linear), K-tiled over F_im.
    # bf16 operands, f32 accumulation into the contiguous concat scratch.
    acc_ref[:, :d_im_pad] += jnp.dot(
        x_im_ref[...], w_im_ref[...], preferred_element_type=jnp.float32)

    @pl.when(k == nk - 1)
    def _():
        # Tabular encoder (stand-in: linear + ReLU); .squeeze() is a no-op for
        # a 2-D (tb, D_tab) activation.  Written into the upper half of the
        # concat scratch (lane-aligned at offset d_im_pad).
        h_tab = jnp.dot(x_tab_ref[...], w_tab_ref[...],
                        preferred_element_type=jnp.float32) + b_tab_ref[...]
        acc_ref[:, d_im_pad:] = jnp.maximum(h_tab, 0.0)

        # head(concat([...], dim=1)): a single fused matmul over the contiguous
        # concat buffer against the full head weight (identical to cat+Linear).
        out = jnp.dot(acc_ref[...].astype(jnp.bfloat16), w_head_ref[...],
                      preferred_element_type=jnp.float32) + b_head_ref[...]
        out_ref[...] = out.astype(out_ref.dtype)


def multimodal_forward(x_img, x_tab, params, *, tb=None, tk=4096):
    """x_img: (B, C, H, W) NCHW imaging input; x_tab: (B, F_tab)."""
    B = x_img.shape[0]
    x_im = x_img.reshape(B, -1)                 # torch.flatten(x, 1) semantics
    F_im = x_im.shape[1]
    F_tab = x_tab.shape[1]
    D_im = params["w_im"].shape[1]
    D_tab = params["w_tab"].shape[1]
    C = params["w_head_im"].shape[1]

    if tb is None:
        # Largest batch tile <= 256 that divides B (256 fills the v6e/v7x MXU
        # in M; for tiny demo batches tb == B).  Do not shrink below this just
        # to create extra "parallel" steps -- MXU fill matters more.
        tb = min(B, 256)
        while B % tb:
            tb -= 1
    assert B % tb == 0, "batch must be divisible by the batch tile"

    d_im_p = _round_up(D_im, LANE)
    d_tab_p = _round_up(D_tab, LANE)
    d_cat = d_im_p + d_tab_p
    c_p = _round_up(C, LANE)
    f_tab_p = _round_up(F_tab, LANE)

    # K-tile selection: prefer a 128-multiple tk that divides the 128-padded
    # F_im (no extra zero columns / zero-DMA work).  When F_im fits (demo:
    # F_im=1024), tk == f_im_p and the K grid collapses to a single step.
    f_im_128 = _round_up(F_im, LANE)
    tk_cap = min(_round_up(tk, LANE), f_im_128)
    tk_sel = tk_cap
    floor = min(1024, f_im_128)
    while f_im_128 % tk_sel and tk_sel - LANE >= floor:
        tk_sel -= LANE
    if f_im_128 % tk_sel == 0:
        tk = tk_sel
        f_im_p = f_im_128
    else:
        tk = tk_cap
        f_im_p = _round_up(F_im, tk)

    bf16 = jnp.bfloat16
    f32 = jnp.float32

    # Inputs: bf16, lane-dense (zero-padded).
    x_im_p = _pad2(x_im.astype(bf16), (B, f_im_p))
    x_tab_p = _pad2(x_tab.astype(bf16), (B, f_tab_p))

    # Encoder weights, stored as (in, out) == nn.Linear weight transposed.
    w_im_p = _pad2(params["w_im"].astype(bf16), (f_im_p, d_im_p))
    w_tab_p = _pad2(params["w_tab"].astype(bf16), (f_tab_p, d_tab_p))
    b_im_p = _pad2(params["b_im"].reshape(1, -1).astype(f32), (1, d_im_p))
    b_tab_p = _pad2(params["b_tab"].reshape(1, -1).astype(f32), (1, d_tab_p))

    # head = nn.Linear(D_im + D_tab, C): one contiguous (d_cat, c_p) weight so
    # the kernel does a single matmul over the concat buffer.  Padded rows of
    # the activations are zero, padded rows/cols of the weight are zero.
    w_head = jnp.zeros((d_cat, c_p), bf16)
    w_head = w_head.at[:D_im, :C].set(params["w_head_im"].astype(bf16))
    w_head = w_head.at[d_im_p:d_im_p + D_tab, :C].set(
        params["w_head_tab"].astype(bf16))
    b_head = _pad2(params["b_head"].reshape(1, -1).astype(f32), (1, c_p))

    grid = (B // tb, f_im_p // tk)
    kernel = functools.partial(_multimodal_kernel, d_im_pad=d_im_p)

    out_p = pl.pallas_call(
        kernel,
        out_shape=jax.ShapeDtypeStruct((B, c_p), f32),
        grid_spec=pltpu.PrefetchScalarGridSpec(
            num_scalar_prefetch=0,
            grid=grid,
            in_specs=[
                pl.BlockSpec((tb, tk), lambda i, k: (i, k)),       # x_im tile
                pl.BlockSpec((tb, f_tab_p), lambda i, k: (i, 0)),  # x_tab tile
                pl.BlockSpec((tk, d_im_p), lambda i, k: (k, 0)),   # W_im (K-tiled)
                _const_spec((1, d_im_p)),                          # b_im
                _const_spec((f_tab_p, d_tab_p)),                   # W_tab
                _const_spec((1, d_tab_p)),                         # b_tab
                _const_spec((d_cat, c_p)),                         # W_head (fused)
                _const_spec((1, c_p)),                             # b_head
            ],
            out_specs=pl.BlockSpec((tb, c_p), lambda i, k: (i, 0)),
            scratch_shapes=[pltpu.VMEM((tb, d_cat), f32)],         # concat/acc
        ),
        compiler_params=pltpu.CompilerParams(
            dimension_semantics=("parallel", "arbitrary"),
            vmem_limit_bytes=32 * 1024 * 1024,   # safe on v7x (64 MiB physical)
        ),
    )(x_im_p, x_tab_p, w_im_p, b_im_p, w_tab_p, b_tab_p, w_head, b_head)

    return out_p[:, :C]


def reference_forward(x_img, x_tab, params):
    """Pure-JAX reference mirroring the PyTorch forward (bf16 operands)."""
    q = lambda a: a.astype(jnp.bfloat16).astype(jnp.float32)
    B = x_img.shape[0]
    x_im = q(x_img.reshape(B, -1))
    h_im = x_im @ q(params["w_im"]) + params["b_im"]
    h_tab = jnp.maximum(q(x_tab) @ q(params["w_tab"]) + params["b_tab"], 0.0)
    feats = jnp.concatenate([h_im, h_tab], axis=1)          # torch.cat(dim=1)
    w_head = jnp.concatenate(
        [params["w_head_im"], params["w_head_tab"]], axis=0)
    return q(feats) @ q(w_head) + params["b_head"]


def init_params(key, F_im, F_tab, D_im, D_tab, num_classes):
    ks = jax.random.split(key, 8)
    s = lambda fan_in: 1.0 / jnp.sqrt(fan_in)
    return {
        # encoders (stored as (in, out), i.e. nn.Linear weight transposed)
        "w_im":  jax.random.normal(ks[0], (F_im, D_im), jnp.float32) * s(F_im),
        "b_im":  jax.random.normal(ks[1], (D_im,), jnp.float32) * 0.01,
        "w_tab": jax.random.normal(ks[2], (F_tab, D_tab), jnp.float32) * s(F_tab),
        "b_tab": jax.random.normal(ks[3], (D_tab,), jnp.float32) * 0.01,
        # head = nn.Linear(D_im + D_tab, num_classes), split along input dim
        "w_head_im":  jax.random.normal(ks[4], (D_im, num_classes),
                                        jnp.float32) * s(D_im + D_tab),
        "w_head_tab": jax.random.normal(ks[5], (D_tab, num_classes),
                                        jnp.float32) * s(D_im + D_tab),
        "b_head": jax.random.normal(ks[6], (num_classes,), jnp.float32) * 0.01,
    }


if __name__ == "__main__":
    # Small shapes consistent with the module (imaging_tabular datatype).
    B, Cch, H, W = 32, 4, 16, 16       # NCHW imaging input -> F_im = 1024
    F_tab = 32                         # tabular features
    D_im, D_tab = 96, 32               # encoder output dims (concat -> 128)
    num_classes = 8

    key = jax.random.PRNGKey(0)
    k_img, k_tab, k_par = jax.random.split(key, 3)
    x_img = jax.random.normal(k_img, (B, Cch, H, W), jnp.float32)
    x_tab = jax.random.normal(k_tab, (B, F_tab), jnp.float32)
    params = init_params(k_par, Cch * H * W, F_tab, D_im, D_tab, num_classes)

    # Defaults: tb = largest divisor of B <= 256 (here tb=B=32, one full-width
    # batch step); tk collapses to f_im_p=1024 so the K axis has a single step.
    out = multimodal_forward(x_img, x_tab, params)
    out = jax.block_until_ready(out)

    ref = reference_forward(x_img, x_tab, params)
    assert out.shape == (B, num_classes)
    assert jnp.allclose(out, ref, atol=1e-2, rtol=1e-2), "mismatch vs reference"

    print("KERNEL_OK")
</pallas_src>

<mosaic_0001>
module attributes {stable_mosaic.version = 11 : i64} {
  func.func @_multimodal_kernel(%arg0: i32, %arg1: i32, %arg2: memref<32x1024xbf16, #tpu.memory_space<vmem>>, %arg3: memref<32x128xbf16, #tpu.memory_space<vmem>>, %arg4: memref<1024x128xbf16, #tpu.memory_space<vmem>>, %arg5: memref<1x128xf32, #tpu.memory_space<vmem>>, %arg6: memref<128x128xbf16, #tpu.memory_space<vmem>>, %arg7: memref<1x128xf32, #tpu.memory_space<vmem>>, %arg8: memref<256x128xbf16, #tpu.memory_space<vmem>>, %arg9: memref<1x128xf32, #tpu.memory_space<vmem>>, %arg10: memref<32x128xf32, #tpu.memory_space<vmem>>, %arg11: memref<32x256xf32, #tpu.memory_space<vmem>>) attributes {dimension_semantics = [#tpu.dimension_semantics<parallel>, #tpu.dimension_semantics<arbitrary>], iteration_bounds = array<i64: 1, 1>, scalar_prefetch = 0 : i64, scratch_operands = 1 : i64, tpu.core_type = #tpu.core_type<tc>, window_params = [{transform_indices = @transform_0, window_bounds = array<i64: 32, 1024>}, {transform_indices = @transform_1, window_bounds = array<i64: 32, 128>}, {transform_indices = @transform_2, window_bounds = array<i64: 1024, 128>}, {pipeline_mode = #tpu.pipeline_mode<synchronous>, transform_indices = @transform_3, window_bounds = array<i64: 1, 128>}, {pipeline_mode = #tpu.pipeline_mode<synchronous>, transform_indices = @transform_4, window_bounds = array<i64: 128, 128>}, {pipeline_mode = #tpu.pipeline_mode<synchronous>, transform_indices = @transform_5, window_bounds = array<i64: 1, 128>}, {pipeline_mode = #tpu.pipeline_mode<synchronous>, transform_indices = @transform_6, window_bounds = array<i64: 256, 128>}, {pipeline_mode = #tpu.pipeline_mode<synchronous>, transform_indices = @transform_7, window_bounds = array<i64: 1, 128>}, {transform_indices = @transform_8, window_bounds = array<i64: 32, 128>}]} {
    %c0_i32 = arith.constant 0 : i32
    %0 = arith.cmpi eq, %arg1, %c0_i32 : i32
    %1 = arith.extui %0 : i1 to i32
    %c0_i32_0 = arith.constant 0 : i32
    %2 = arith.cmpi ne, %1, %c0_i32_0 : i32
    scf.if %2 {
      %c0_10 = arith.constant 0 : index
      %c0_11 = arith.constant 0 : index
      %12 = vector.load %arg5[%c0_10, %c0_11] : memref<1x128xf32, #tpu.memory_space<vmem>>, vector<1x128xf32>
      %13 = vector.shape_cast %12 : vector<1x128xf32> to vector<1x128xf32>
      %14 = vector.broadcast %13 : vector<1x128xf32> to vector<32x128xf32>
      %c0_12 = arith.constant 0 : index
      %c0_13 = arith.constant 0 : index
      %15 = vector.load %arg11[%c0_12, %c0_13] : memref<32x256xf32, #tpu.memory_space<vmem>>, vector<32x128xf32>
      tpu.vector_store %arg11[%c0_12, %c0_13], %14 {strides = array<i32>} : memref<32x256xf32, #tpu.memory_space<vmem>>, vector<32x128xf32>,
    } else {
    }
    %c0 = arith.constant 0 : index
    %c0_1 = arith.constant 0 : index
    %3 = vector.load %arg11[%c0, %c0_1] : memref<32x256xf32, #tpu.memory_space<vmem>>, vector<32x128xf32>
    %c0_2 = arith.constant 0 : index
    %c0_3 = arith.constant 0 : index
    %4 = vector.load %arg2[%c0_2, %c0_3] : memref<32x1024xbf16, #tpu.memory_space<vmem>>, vector<32x1024xbf16>
    %c0_4 = arith.constant 0 : index
    %c0_5 = arith.constant 0 : index
    %5 = vector.load %arg4[%c0_4, %c0_5] : memref<1024x128xbf16, #tpu.memory_space<vmem>>, vector<1024x128xbf16>
    %cst = arith.constant dense<0.000000e+00> : vector<32x128xf32>
    %6 = tpu.matmul %4, %5, %cst {dimension_numbers = #tpu.dot_dimension_numbers<[1], [0], [0], [1], [0, 0, 1, 1], [], []>} : vector<32x1024xbf16>, vector<1024x128xbf16>, vector<32x128xf32> -> vector<32x128xf32>
    %7 = arith.addf %3, %6 : vector<32x128xf32>
    %c0_6 = arith.constant 0 : index
    %c0_7 = arith.constant 0 : index
    %8 = vector.load %arg11[%c0_6, %c0_7] : memref<32x256xf32, #tpu.memory_space<vmem>>, vector<32x128xf32>
    tpu.vector_store %arg11[%c0_6, %c0_7], %7 {strides = array<i32>} : memref<32x256xf32, #tpu.memory_space<vmem>>, vector<32x128xf32>,
    %c0_i32_8 = arith.constant 0 : i32
    %9 = arith.cmpi eq, %arg1, %c0_i32_8 : i32
    %10 = arith.extui %9 : i1 to i32
    %c0_i32_9 = arith.constant 0 : i32
    %11 = arith.cmpi ne, %10, %c0_i32_9 : i32
    scf.if %11 {
      %c0_10 = arith.constant 0 : index
      %c0_11 = arith.constant 0 : index
      %12 = vector.load %arg3[%c0_10, %c0_11] : memref<32x128xbf16, #tpu.memory_space<vmem>>, vector<32x128xbf16>
      %c0_12 = arith.constant 0 : index
      %c0_13 = arith.constant 0 : index
      %13 = vector.load %arg6[%c0_12, %c0_13] : memref<128x128xbf16, #tpu.memory_space<vmem>>, vector<128x128xbf16>
      %cst_14 = arith.constant dense<0.000000e+00> : vector<32x128xf32>
      %14 = tpu.matmul %12, %13, %cst_14 {dimension_numbers = #tpu.dot_dimension_numbers<[1], [0], [0], [1], [0, 0, 1, 1], [], []>} : vector<32x128xbf16>, vector<128x128xbf16>, vector<32x128xf32> -> vector<32x128xf32>
      %c0_15 = arith.constant 0 : index
      %c0_16 = arith.constant 0 : index
      %15 = vector.load %arg7[%c0_15, %c0_16] : memref<1x128xf32, #tpu.memory_space<vmem>>, vector<1x128xf32>
      %16 = vector.broadcast %15 : vector<1x128xf32> to vector<32x128xf32>
      %17 = arith.addf %14, %16 : vector<32x128xf32>
      %cst_17 = arith.constant 0.000000e+00 : f32
      %18 = vector.broadcast %cst_17 : f32 to vector<32x128xf32>
      %19 = arith.maximumf %17, %18 : vector<32x128xf32>
      %c0_18 = arith.constant 0 : index
      %c128 = arith.constant 128 : index
      %20 = vector.load %arg11[%c0_18, %c128] : memref<32x256xf32, #tpu.memory_space<vmem>>, vector<32x128xf32>
      tpu.vector_store %arg11[%c0_18, %c128], %19 {strides = array<i32>} : memref<32x256xf32, #tpu.memory_space<vmem>>, vector<32x128xf32>,
      %c0_19 = arith.constant 0 : index
      %c0_20 = arith.constant 0 : index
      %21 = vector.load %arg11[%c0_19, %c0_20] : memref<32x256xf32, #tpu.memory_space<vmem>>, vector<32x256xf32>
      %22 = arith.truncf %21 : vector<32x256xf32> to vector<32x256xbf16>
      %c0_21 = arith.constant 0 : index
      %c0_22 = arith.constant 0 : index
      %23 = vector.load %arg8[%c0_21, %c0_22] : memref<256x128xbf16, #tpu.memory_space<vmem>>, vector<256x128xbf16>
      %cst_23 = arith.constant dense<0.000000e+00> : vector<32x128xf32>
      %24 = tpu.matmul %22, %23, %cst_23 {dimension_numbers = #tpu.dot_dimension_numbers<[1], [0], [0], [1], [0, 0, 1, 1], [], []>} : vector<32x256xbf16>, vector<256x128xbf16>, vector<32x128xf32> -> vector<32x128xf32>
      %c0_24 = arith.constant 0 : index
      %c0_25 = arith.constant 0 : index
      %25 = vector.load %arg9[%c0_24, %c0_25] : memref<1x128xf32, #tpu.memory_space<vmem>>, vector<1x128xf32>
      %26 = vector.broadcast %25 : vector<1x128xf32> to vector<32x128xf32>
      %27 = arith.addf %24, %26 : vector<32x128xf32>
      %c0_26 = arith.constant 0 : index
      %c0_27 = arith.constant 0 : index
      %28 = vector.load %arg10[%c0_26, %c0_27] : memref<32x128xf32, #tpu.memory_space<vmem>>, vector<32x128xf32>
      tpu.vector_store %arg10[%c0_26, %c0_27], %27 {strides = array<i32>} : memref<32x128xf32, #tpu.memory_space<vmem>>, vector<32x128xf32>,
    } else {
    }
    return
  }
  func.func @transform_0(%arg0: i32, %arg1: i32) -> (i32, i32) {
    %c0_i32 = arith.constant 0 : i32
    return %arg0, %arg1 : i32, i32
  }
  func.func @transform_1(%arg0: i32, %arg1: i32) -> (i32, i32) {
    %c0_i32 = arith.constant 0 : i32
    %c0_i32_0 = arith.constant 0 : i32
    return %arg0, %c0_i32 : i32, i32
  }
  func.func @transform_2(%arg0: i32, %arg1: i32) -> (i32, i32) {
    %c0_i32 = arith.constant 0 : i32
    %c0_i32_0 = arith.constant 0 : i32
    return %arg1, %c0_i32 : i32, i32
  }
  func.func @transform_3(%arg0: i32, %arg1: i32) -> (i32, i32) {
    %c0_i32 = arith.constant 0 : i32
    %c0_i32_0 = arith.constant 0 : i32
    %c0_i32_1 = arith.constant 0 : i32
    return %c0_i32, %c0_i32_0 : i32, i32
  }
  func.func @transform_4(%arg0: i32, %arg1: i32) -> (i32, i32) {
    %c0_i32 = arith.constant 0 : i32
    %c0_i32_0 = arith.constant 0 : i32
    %c0_i32_1 = arith.constant 0 : i32
    return %c0_i32, %c0_i32_0 : i32, i32
  }
  func.func @transform_5(%arg0: i32, %arg1: i32) -> (i32, i32) {
    %c0_i32 = arith.constant 0 : i32
    %c0_i32_0 = arith.constant 0 : i32
    %c0_i32_1 = arith.constant 0 : i32
    return %c0_i32, %c0_i32_0 : i32, i32
  }
  func.func @transform_6(%arg0: i32, %arg1: i32) -> (i32, i32) {
    %c0_i32 = arith.constant 0 : i32
    %c0_i32_0 = arith.constant 0 : i32
    %c0_i32_1 = arith.constant 0 : i32
    return %c0_i32, %c0_i32_0 : i32, i32
  }
  func.func @transform_7(%arg0: i32, %arg1: i32) -> (i32, i32) {
    %c0_i32 = arith.constant 0 : i32
    %c0_i32_0 = arith.constant 0 : i32
    %c0_i32_1 = arith.constant 0 : i32
    return %c0_i32, %c0_i32_0 : i32, i32
  }
  func.func @transform_8(%arg0: i32, %arg1: i32) -> (i32, i32) {
    %c0_i32 = arith.constant 0 : i32
    %c0_i32_0 = arith.constant 0 : i32
    return %arg0, %c0_i32 : i32, i32
  }
}

</mosaic_0001>

<bundles_post_ra>
// kernel: tpu_custom_call.1
= control target key start
LH: loop header
LB: loop body
LE: loop exit
PB: predicated region body
PF: predicated region fallthrough
CT: control target
= control target key end

     0   :  { %13 = vsyncpa [#allocation4], 0  ;;  %s1901_s0 = inlined_call_operand.hbm [shape: bf16[32,1024], index: 0, kind: input, shape index: {}]   ;;  %s1902_s1 = inlined_call_operand.hbm [shape: bf16[32,128], index: 1, kind: input, shape index: {}]   ;;  %s1903_s2 = inlined_call_operand.hbm [shape: bf16[1024,128], index: 2, kind: input, shape index: {}]   ;;  %s1904_s3 = inlined_call_operand.vmem [shape: f32[1,128], index: 3, kind: input, shape index: {}]   ;;  %s1905_s4 = inlined_call_operand.hbm [shape: bf16[128,128], index: 4, kind: input, shape index: {}]   ;;  %s1906_s5 = inlined_call_operand.vmem [shape: f32[1,128], index: 5, kind: input, shape index: {}]   ;;  %s1907_s6 = inlined_call_operand.hbm [shape: bf16[256,128], index: 6, kind: input, shape index: {}]   ;;  %s1908_s7 = inlined_call_operand.vmem [shape: f32[1,128], index: 7, kind: input, shape index: {}]   ;;  %s1909_s8 = inlined_call_operand.hbm [shape: f32[32,128], index: 8, kind: output, shape index: {}]  }
   0x1   :  { %14 = vsyncpa [#allocation7], 0 }
   0x2   :  { %15 = vsyncpa [#allocation10], 0 }
   0x3   :  { %16 = vsyncpa [#allocation5], 0  ;;  %s1805_s27 = smov [#allocation6]  }
   0x4   :  { %s34_s28 = sshll.u32 %s1805_s27, 4  ;;  %s35_s28 = int_to_ptr.vmem [resolvable:$true] %s34_s28 }
   0x5   :  { %s1685_s29 = scalar_lea.vmem %s35_s28, 256  ;;  %p1690_p1 = scmp.lt.s32.totalorder %s35_s28, %s35_s28 }
   0x6   :  { %p1686_p0 = scmp.ne.s32.totalorder %s35_s28, %s1685_s29  ;;  %p1691_p2 = scmp.lt.s32.totalorder %s1685_s29, %s1685_s29 }
   0x8   :  { %p1692_p3 = por %p1691_p2, %p1690_p1 }
   0xa   :  { %p1693_p4 = pnand %p1692_p3, %p1686_p0 }
   0xc   :  { %1696 = shalt.err (!%p1693_p4)
}
   0xd   :  { %s1806_s30 = smov 64   ;;  %s1807_s9 = smov 4  }
   0xe   :  { %40 = dma.hbm_to_vmem [thread:$0]  %s1902_s1, 256, %s35_s28, [#allocation7], %s1806_s30, %s1806_s30, %s1807_s9  }
   0xf   :  { %s1808_s12 = smov [#allocation9]   ;;  %s1809_s14 = smov [#allocation3]  }
  0x10   :  { %s60_s13 = sshll.u32 %s1808_s12, 4  ;;  %s22_s15 = sshll.u32 %s1809_s14, 4  ;;  %s61_s13 = int_to_ptr.vmem [resolvable:$true] %s60_s13  ;;  %s23_s15 = int_to_ptr.vmem [resolvable:$true] %s22_s15 }
  0x11   :  { %s1705_s16 = scalar_lea.vmem %s61_s13, 1024  ;;  %p1710_p6 = scmp.lt.s32.totalorder %s61_s13, %s61_s13 }
  0x12   :  { %p1706_p5 = scmp.ne.s32.totalorder %s61_s13, %s1705_s16  ;;  %p1711_p7 = scmp.lt.s32.totalorder %s1705_s16, %s1705_s16 }
  0x14   :  { %p1712_p8 = por %p1711_p7, %p1710_p6 }
  0x16   :  { %p1713_p9 = pnand %p1712_p8, %p1706_p5 }
  0x18   :  { %1716 = shalt.err (!%p1713_p9)
}
  0x19   :  { %66 = dma.hbm_to_vmem [thread:$0]  %s1905_s4, 1024, %s61_s13, [#allocation10], %s1806_s30, %s1806_s30, %s1807_s9  }
  0x1a   :  { %s1725_s1 = scalar_lea.vmem %s23_s15, 2048  ;;  %p1730_p11 = scmp.lt.s32.totalorder %s23_s15, %s23_s15 }
  0x1b   :  { %p1726_p10 = scmp.ne.s32.totalorder %s23_s15, %s1725_s1  ;;  %p1731_p12 = scmp.lt.s32.totalorder %s1725_s1, %s1725_s1 }
  0x1d   :  { %p1732_p13 = por %p1731_p12, %p1730_p11 }
  0x1f   :  { %p1733_p0 = pnand %p1732_p13, %p1726_p10 }
  0x21   :  { %1736 = shalt.err (!%p1733_p0)
}
  0x22   :  { %s1810_s19 = smov 512   ;;  %s1811_s20 = smov 32  }
  0x23   :  { %28 = dma.hbm_to_vmem [thread:$0]  %s1901_s0, 2048, %s23_s15, [#allocation4], %s1810_s19, %s1810_s19, %s1811_s20  }
  0x24   :  { %s1812_s23 = smov [#allocation8]   ;;  %s1813_s25 = smov [#allocation11]  }
  0x25   :  { %s46_s24 = sshll.u32 %s1812_s23, 4  ;;  %s74_s26 = sshll.u32 %s1813_s25, 4  ;;  %s47_s24 = int_to_ptr.vmem [resolvable:$true] %s46_s24  ;;  %s75_s26 = int_to_ptr.vmem [resolvable:$true] %s74_s26 }
  0x26   :  { %s1745_s4 = scalar_lea.vmem %s47_s24, 8192  ;;  %p1750_p2 = scmp.lt.s32.totalorder %s47_s24, %s47_s24 }
  0x27   :  { %p1746_p1 = scmp.ne.s32.totalorder %s47_s24, %s1745_s4  ;;  %p1751_p3 = scmp.lt.s32.totalorder %s1745_s4, %s1745_s4 }
  0x29   :  { %p1752_p4 = por %p1751_p3, %p1750_p2 }
  0x2b   :  { %p1753_p5 = pnand %p1752_p4, %p1746_p1 }
  0x2d   :  { %1756 = shalt.err (!%p1753_p5)
}
  0x2e   :  { %52 = dma.hbm_to_vmem [thread:$0]  %s1903_s2, 8192, %s47_s24, [#allocation7], %s1806_s30, %s1806_s30, %s1807_s9  }
  0x2f   :  { %s1765_s0 = scalar_lea.vmem %s75_s26, 2048  ;;  %p1770_p7 = scmp.lt.s32.totalorder %s75_s26, %s75_s26 }
  0x30   :  { %p1766_p6 = scmp.ne.s32.totalorder %s75_s26, %s1765_s0  ;;  %p1771_p8 = scmp.lt.s32.totalorder %s1765_s0, %s1765_s0 }
  0x32   :  { %p1772_p9 = por %p1771_p8, %p1770_p7 }
  0x34   :  { %p1773_p10 = pnand %p1772_p9, %p1766_p6 }
  0x36   :  { %1776 = shalt.err (!%p1773_p10)
}
  0x37   :  { %80 = dma.hbm_to_vmem [thread:$0]  %s1907_s6, 2048, %s75_s26, [#allocation10], %s1806_s30, %s1806_s30, %s1807_s9  }
  0x38   :  { %1797 = dma.done.wait [#allocation4], 2048  }
  0x39   :  { %1798 = vsyncadd [#allocation4], 4294965248 }
  0x3a   :  { %1799 = dma.done.wait [#allocation7], 8448  }
  0x3b   :  { %1800 = vsyncadd [#allocation7], 4294958848 }
  0x3c   :  { %1801 = dma.done.wait [#allocation10], 3072  }
  0x3d   :  { %1802 = vsyncadd [#allocation10], 4294964224  ;;  %v1587_v0 = vld [vmem:[#allocation8 + $0x78] sm:$0xff]   ;;  %v1591_v4 = vld [vmem:[#allocation8 + $0x70] sm:$0xff]   ;;  %s1814_s11 = smov [#allocation12]  }
  0x3e   :  { %v1588_v1 = vld [vmem:[#allocation8 + $0xf8] sm:$0xff]   ;;  %1405 = vmatprep.subr.bf16.mxu0 %v1587_v0  ;;  %v1592_v5 = vld [vmem:[#allocation8 + $0xf0] sm:$0xff]   ;;  %v1595_v8 = vld [vmem:[#allocation8 + $0x68] sm:$0xff]   ;;  %s1282_s12 = sshll.u32 %s1814_s11, 4  ;;  %s1283_s12 = int_to_ptr.vmem [resolvable:$true] %s1282_s12 }
  0x3f   :  { %v1589_v2 = vld [vmem:[#allocation8 + $0x38] sm:$0xff]   ;;  %1433 = vmatprep.subr.bf16.mxu1 %v1588_v1  ;;  %v1593_v6 = vld [vmem:[#allocation8 + $0x30] sm:$0xff]   ;;  %v1596_v9 = vld [vmem:[#allocation8 + $0xe8] sm:$0xff]   ;;  %p1782_p12 = scmp.lt.s32.totalorder %s1283_s12, %s1283_s12 }
  0x40   :  { %v1590_v3 = vld [vmem:[#allocation8 + $0xb8] sm:$0xff]   ;;  %1406 = vmatpush3.bf16.msra.mxu0 %v1589_v2  ;;  %v1594_v7 = vld [vmem:[#allocation8 + $0xb0] sm:$0xff]   ;;  %v1597_v10 = vld [vmem:[#allocation8 + $0x28] sm:$0xff]  }
  0x41   :  { %1434 = vmatpush3.bf16.msra.mxu1 %v1590_v3  ;;  %1407 = vmatprep.subr.bf16.mxu0 %v1591_v4  ;;  %v1598_v11 = vld [vmem:[#allocation8 + $0xa8] sm:$0xff]   ;;  %v1599_v12 = vld [vmem:[#allocation8 + $0x60] sm:$0xff]   ;;  %v1603_v16 = vld [vmem:[#allocation8 + $0x58] sm:$0xff]  }
  0x42   :  { %1435 = vmatprep.subr.bf16.mxu1 %v1592_v5  ;;  %v1600_v13 = vld [vmem:[#allocation8 + $0xe0] sm:$0xff]   ;;  %v1604_v17 = vld [vmem:[#allocation8 + $0xd8] sm:$0xff]   ;;  %v1607_v20 = vld [vmem:[#allocation8 + $0x50] sm:$0xff]  }
  0x43   :  { %v1601_v14 = vld [vmem:[#allocation8 + $0x20] sm:$0xff]   ;;  %v1605_v18 = vld [vmem:[#allocation8 + $0x18] sm:$0xff]   ;;  %v1608_v21 = vld [vmem:[#allocation8 + $0xd0] sm:$0xff]  }
  0x44   :  { %1408 = vmatpush3.bf16.msra.mxu0 %v1593_v6  ;;  %v1602_v15 = vld [vmem:[#allocation8 + $0xa0] sm:$0xff]   ;;  %v1606_v19 = vld [vmem:[#allocation8 + $0x98] sm:$0xff]   ;;  %v1609_v22 = vld [vmem:[#allocation8 + $0x10] sm:$0xff]  }
  0x45   :  { %1436 = vmatpush3.bf16.msra.mxu1 %v1594_v7  ;;  %1409 = vmatprep.subr.bf16.mxu0 %v1595_v8  ;;  %v1610_v23 = vld [vmem:[#allocation8 + $0x90] sm:$0xff]   ;;  %v1611_v24 = vld [vmem:[#allocation8 + $0x48] sm:$0xff]   ;;  %v1615_v28 = vld [vmem:[#allocation8 + $0x40] sm:$0xff]  }
  0x46   :  { %1437 = vmatprep.subr.bf16.mxu1 %v1596_v9  ;;  %v1612_v25 = vld [vmem:[#allocation8 + $0xc8] sm:$0xff]   ;;  %v1616_v29 = vld [vmem:[#allocation8 + $0xc0] sm:$0xff]   ;;  %v118_v32 = vld [vmem:[#allocation3] sm:$0xff] }
  0x47   :  { %v1613_v26 = vld [vmem:[#allocation8 + $0x8] sm:$0xff]   ;;  %v1617_v30 = vld [vmem:[#allocation8] sm:$0xff]   ;;  %v122_v33 = vld [vmem:[#allocation3 + $0x20] sm:$0xff] }
  0x48   :  { %1410 = vmatpush3.bf16.msra.mxu0 %v1597_v10  ;;  %v1614_v27 = vld [vmem:[#allocation8 + $0x88] sm:$0xff]   ;;  %v1618_v31 = vld [vmem:[#allocation8 + $0x80] sm:$0xff]   ;;  %v119_v34 = vld [vmem:[#allocation3 + $0x8] sm:$0xff]  ;;  %v1297_v35 = vcombine.low %v118_v32, %v122_v33  ;;  %v1298_v36 = vcombine.high %v118_v32, %v122_v33 }
  0x49   :  { %1438 = vmatpush3.bf16.msra.mxu1 %v1598_v11  ;;  %1411 = vmatprep.subr.bf16.mxu0 %v1599_v12  ;;  %v123_v37 = vld [vmem:[#allocation3 + $0x28] sm:$0xff]  ;;  %v1623_v44 = vld [vmem:[#allocation8 + $0x170] sm:$0xff]   ;;  %v1627_v48 = vld [vmem:[#allocation8 + $0x168] sm:$0xff]  }
  0x4a   :  { %1439 = vmatprep.subr.bf16.mxu1 %v1600_v13  ;;  %v1299_v38 = vcombine.low %v119_v34, %v123_v37  ;;  %v1300_v39 = vcombine.high %v119_v34, %v123_v37  ;;  %v1619_v40 = vld [vmem:[#allocation8 + $0x178] sm:$0xff]   ;;  %758 = vmatprep.mubr.bf16.mxu0 %v1298_v36  ;;  %v1624_v45 = vld [vmem:[#allocation8 + $0x130] sm:$0xff]   ;;  %v1628_v49 = vld [vmem:[#allocation8 + $0x128] sm:$0xff]  }
  0x4b   :  { %v1620_v41 = vld [vmem:[#allocation8 + $0x138] sm:$0xff]   ;;  %v1625_v46 = vld [vmem:[#allocation8 + $0x1f0] sm:$0xff]   ;;  %v1629_v50 = vld [vmem:[#allocation8 + $0x1e8] sm:$0xff]  }
  0x4c   :  { %1412 = vmatpush3.bf16.msra.mxu0 %v1601_v14  ;;  %807 = vmatprep.mubr.bf16.mxu1 %v1300_v39  ;;  %v1621_v42 = vld [vmem:[#allocation8 + $0x1f8] sm:$0xff]   ;;  %v1626_v47 = vld [vmem:[#allocation8 + $0x1b0] sm:$0xff]   ;;  %v1630_v51 = vld [vmem:[#allocation8 + $0x1a8] sm:$0xff]  }
  0x4d   :  { %1440 = vmatpush3.bf16.msra.mxu1 %v1602_v15  ;;  %1413 = vmatprep.subr.bf16.mxu0 %v1603_v16  ;;  %v1622_v43 = vld [vmem:[#allocation8 + $0x1b8] sm:$0xff]   ;;  %v1631_v52 = vld [vmem:[#allocation8 + $0x160] sm:$0xff]   ;;  %v126_v58 = vld [vmem:[#allocation3 + $0x40] sm:$0xff] }
  0x4e   :  { %1441 = vmatprep.subr.bf16.mxu1 %v1604_v17  ;;  %v1632_v53 = vld [vmem:[#allocation8 + $0x120] sm:$0xff]   ;;  %v1635_v56 = vld [vmem:[#allocation8 + $0x158] sm:$0xff]   ;;  %v130_v59 = vld [vmem:[#allocation3 + $0x60] sm:$0xff] }
  0x4f   :  { %v1633_v54 = vld [vmem:[#allocation8 + $0x1e0] sm:$0xff]   ;;  %v1636_v57 = vld [vmem:[#allocation8 + $0x118] sm:$0xff]   ;;  %v1306_v60 = vcombine.high %v126_v58, %v130_v59  ;;  %v1305_v63 = vcombine.low %v126_v58, %v130_v59  ;;  %v1639_v4 = vld [vmem:[#allocation8 + $0x150] sm:$0xff]  }
  0x50   :  { %1414 = vmatpush3.bf16.msra.mxu0 %v1605_v18  ;;  %v1634_v55 = vld [vmem:[#allocation8 + $0x1a0] sm:$0xff]   ;;  %v127_v61 = vld [vmem:[#allocation3 + $0x48] sm:$0xff]  ;;  %v1640_v5 = vld [vmem:[#allocation8 + $0x110] sm:$0xff]  }
  0x51   :  { %1442 = vmatpush3.bf16.msra.mxu1 %v1606_v19  ;;  %1415 = vmatprep.subr.bf16.mxu0 %v1607_v20  ;;  %v131_v62 = vld [vmem:[#allocation3 + $0x68] sm:$0xff]  ;;  %v1641_v6 = vld [vmem:[#allocation8 + $0x1d0] sm:$0xff]   ;;  %v1643_v8 = vld [vmem:[#allocation8 + $0x148] sm:$0xff]  }
  0x52   :  { %1443 = vmatprep.subr.bf16.mxu1 %v1608_v21  ;;  %v1308_v0 = vcombine.high %v127_v61, %v131_v62  ;;  %v1637_v1 = vld [vmem:[#allocation8 + $0x1d8] sm:$0xff]   ;;  %v1307_v2 = vcombine.low %v127_v61, %v131_v62  ;;  %v1642_v7 = vld [vmem:[#allocation8 + $0x190] sm:$0xff]   ;;  %v1644_v9 = vld [vmem:[#allocation8 + $0x108] sm:$0xff]  }
  0x53   :  { %v1638_v3 = vld [vmem:[#allocation8 + $0x198] sm:$0xff]   ;;  %v1645_v10 = vld [vmem:[#allocation8 + $0x1c8] sm:$0xff]   ;;  %v1647_v12 = vld [vmem:[#allocation8 + $0x140] sm:$0xff]  }
  0x54   :  { %1416 = vmatpush3.bf16.msra.mxu0 %v1609_v22  ;;  %v1646_v11 = vld [vmem:[#allocation8 + $0x188] sm:$0xff]   ;;  %v1648_v13 = vld [vmem:[#allocation8 + $0x100] sm:$0xff]   ;;  %v1651_v20 = vld [vmem:[#allocation9 + $0x38] sm:$0xff]  }
  0x55   :  { %1444 = vmatpush3.bf16.msra.mxu1 %v1610_v23  ;;  %1417 = vmatprep.subr.bf16.mxu0 %v1611_v24  ;;  %v1649_v14 = vld [vmem:[#allocation8 + $0x1c0] sm:$0xff]   ;;  %v121_v21 = vld [vmem:[#allocation3 + $0x18] sm:$0xff]  ;;  %v1659_v36 = vld [vmem:[#allocation6] sm:$0xff]  }
  0x56   :  { %1445 = vmatprep.subr.bf16.mxu1 %v1612_v25  ;;  %v120_v15 = vld [vmem:[#allocation3 + $0x10] sm:$0xff]  ;;  %v125_v22 = vld [vmem:[#allocation3 + $0x38] sm:$0xff]  ;;  %v1652_v25 = vld [vmem:[#allocation9 + $0x30] sm:$0xff]  }
  0x57   :  { %v124_v16 = vld [vmem:[#allocation3 + $0x30] sm:$0xff]  ;;  %v1303_v23 = vcombine.low %v121_v21, %v125_v22  ;;  %v1304_v24 = vcombine.high %v121_v21, %v125_v22  ;;  %v1655_v37 = vld [vmem:[#allocation9 + $0x18] sm:$0xff]   ;;  %v1657_v39 = vld [vmem:[#allocation9 + $0x8] sm:$0xff]  }
  0x58   :  { %1418 = vmatpush3.bf16.msra.mxu0 %v1613_v26  ;;  %v1301_v17 = vcombine.low %v120_v15, %v124_v16  ;;  %v1302_v18 = vcombine.high %v120_v15, %v124_v16  ;;  %v1650_v19 = vld [vmem:[#allocation8 + $0x180] sm:$0xff]  }
  0x59   :  { %1446 = vmatpush3.bf16.msra.mxu1 %v1614_v27  ;;  %1419 = vmatprep.subr.bf16.mxu0 %v1615_v28  ;;  %v128_v26 = vld [vmem:[#allocation3 + $0x50] sm:$0xff] }
  0x5a   :  { %1447 = vmatprep.subr.bf16.mxu1 %v1616_v29  ;;  %v132_v27 = vld [vmem:[#allocation3 + $0x70] sm:$0xff]  ;;  %v1653_v29 = vld [vmem:[#allocation9 + $0x28] sm:$0xff]  }
  0x5b   :  { %v1310_v28 = vcombine.high %v128_v26, %v132_v27  ;;  %v1309_v33 = vcombine.low %v128_v26, %v132_v27 }
  0x5c   :  { %1420 = vmatpush3.bf16.msra.mxu0 %v1617_v30  ;;  %v129_v30 = vld [vmem:[#allocation3 + $0x58] sm:$0xff] }
  0x5d   :  { %1448 = vmatpush3.bf16.msra.mxu1 %v1618_v31  ;;  %1461 = vmatprep.subr.bf16.mxu0 %v1619_v40  ;;  %v133_v31 = vld [vmem:[#allocation3 + $0x78] sm:$0xff]  ;;  %v1658_v40 = vld [vmem:[#allocation9] sm:$0xff]  }
  0x5e   :  { %1489 = vmatprep.subr.bf16.mxu1 %v1621_v42  ;;  %v1312_v32 = vcombine.high %v129_v30, %v133_v31  ;;  %v1311_v34 = vcombine.low %v129_v30, %v133_v31  ;;  %v1661_v42 = vld [vmem:[#allocation11 + $0x78] sm:$0xff]  }
  0x5f   :  { %759 = vmatmul.mubr.bf16.vlgmr.msra.gmra.mxu0 %v1297_v35  ;;  %v1654_v35 = vld [vmem:[#allocation9 + $0x20] sm:$0xff]  }
  0x60   :  { %808 = vmatmul.mubr.bf16.vlgmr.msra.gmra.mxu1 %v1299_v38  ;;  %1462 = vmatpush3.bf16.msra.mxu0 %v1620_v41  ;;  %v1656_v38 = vld [vmem:[#allocation9 + $0x10] sm:$0xff]   ;;  %v1660_v41 = vld [vmem:[#allocation6 + $0x8] sm:$0xff]  }
  0x61   :  { %1490 = vmatpush3.bf16.msra.mxu1 %v1622_v43  ;;  %1463 = vmatprep.subr.bf16.mxu0 %v1623_v44  ;;  %v1662_v43 = vld [vmem:[#allocation11 + $0x38] sm:$0xff]   ;;  %v1663_v44 = vld [vmem:[#allocation11 + $0x70] sm:$0xff]  }
  0x62   :  { %1491 = vmatprep.subr.bf16.mxu1 %v1625_v46  ;;  %766 = vmatprep.mubr.bf16.mxu0 %v1306_v60  ;;  %v1665_v46 = vld [vmem:[#allocation11 + $0x68] sm:$0xff]  }
  0x63   :  { %815 = vmatprep.mubr.bf16.mxu1 %v1308_v0 }
  0x64   :  { %1464 = vmatpush3.bf16.msra.mxu0 %v1624_v45  ;;  %v1664_v45 = vld [vmem:[#allocation11 + $0x30] sm:$0xff]  }
  0x65   :  { %1492 = vmatpush3.bf16.msra.mxu1 %v1626_v47  ;;  %1465 = vmatprep.subr.bf16.mxu0 %v1627_v48  ;;  %v1666_v47 = vld [vmem:[#allocation11 + $0x28] sm:$0xff]   ;;  %v1667_v48 = vld [vmem:[#allocation11 + $0x60] sm:$0xff]  }
  0x66   :  { %1493 = vmatprep.subr.bf16.mxu1 %v1629_v50  ;;  %v1669_v50 = vld [vmem:[#allocation11 + $0x58] sm:$0xff]  }
  0x67   :  { %767 = vmatmul.mubr.bf16.gmra.mxu0 %v1305_v63 }
  0x68   :  { %1466 = vmatpush3.bf16.msra.mxu0 %v1628_v49  ;;  %816 = vmatmul.mubr.bf16.gmra.mxu1 %v1307_v2  ;;  %v1668_v49 = vld [vmem:[#allocation11 + $0x20] sm:$0xff]  }
  0x69   :  { %1494 = vmatpush3.bf16.msra.mxu1 %v1630_v51  ;;  %1467 = vmatprep.subr.bf16.mxu0 %v1631_v52  ;;  %v1670_v51 = vld [vmem:[#allocation11 + $0x18] sm:$0xff]   ;;  %v1671_v52 = vld [vmem:[#allocation11 + $0x50] sm:$0xff]  }
  0x6a   :  { %1495 = vmatprep.subr.bf16.mxu1 %v1633_v54  ;;  %856 = vmatprep.mubr.bf16.mxu0 %v1302_v18  ;;  %v1673_v54 = vld [vmem:[#allocation11 + $0x48] sm:$0xff]  }
  0x6b   :  { %905 = vmatprep.mubr.bf16.mxu1 %v1304_v24 }
  0x6c   :  { %1468 = vmatpush3.bf16.msra.mxu0 %v1632_v53  ;;  %v1672_v53 = vld [vmem:[#allocation11 + $0x10] sm:$0xff]  }
  0x6d   :  { %1496 = vmatpush3.bf16.msra.mxu1 %v1634_v55  ;;  %1469 = vmatprep.subr.bf16.mxu0 %v1635_v56  ;;  %v1674_v55 = vld [vmem:[#allocation11 + $0x8] sm:$0xff]   ;;  %v1675_v56 = vld [vmem:[#allocation11 + $0x40] sm:$0xff]  }
  0x6e   :  { %1497 = vmatprep.subr.bf16.mxu1 %v1637_v1 }
  0x70   :  { %1470 = vmatpush3.bf16.msra.mxu0 %v1636_v57  ;;  %v1676_v57 = vld [vmem:[#allocation11] sm:$0xff]  }
  0x71   :  { %1498 = vmatpush3.bf16.msra.mxu1 %v1638_v3  ;;  %1471 = vmatprep.subr.bf16.mxu0 %v1639_v4 }
  0x72   :  { %1499 = vmatprep.subr.bf16.mxu1 %v1641_v6 }
  0x74   :  { %1472 = vmatpush3.bf16.msra.mxu0 %v1640_v5 }
  0x75   :  { %1500 = vmatpush3.bf16.msra.mxu1 %v1642_v7  ;;  %1473 = vmatprep.subr.bf16.mxu0 %v1643_v8 }
  0x76   :  { %1501 = vmatprep.subr.bf16.mxu1 %v1645_v10 }
  0x78   :  { %1474 = vmatpush3.bf16.msra.mxu0 %v1644_v9 }
  0x79   :  { %1502 = vmatpush3.bf16.msra.mxu1 %v1646_v11  ;;  %1475 = vmatprep.subr.bf16.mxu0 %v1647_v12 }
  0x7a   :  { %1503 = vmatprep.subr.bf16.mxu1 %v1649_v14 }
  0x7c   :  { %1476 = vmatpush3.bf16.msra.mxu0 %v1648_v13 }
  0x7d   :  { %1504 = vmatpush3.bf16.msra.mxu1 %v1650_v19  ;;  %1555 = vmatprep.subr.bf16.mxu0 %v1651_v20 }
  0x7e   :  { %1527 = vmatprep.subr.bf16.mxu1 %v1661_v42 }
  0x7f   :  { %857 = vmatmul.mubr.bf16.vlgmr.msra.gmra.mxu0 %v1301_v17 }
  0x80   :  { %1556 = vmatpush3.bf16.msra.mxu0 %v1651_v20  ;;  %906 = vmatmul.mubr.bf16.vlgmr.msra.gmra.mxu1 %v1303_v23 }
  0x81   :  { %1557 = vmatprep.subr.bf16.mxu0 %v1652_v25  ;;  %864 = vmatprep.mubr.bf16.mxu0 %v1310_v28 }
  0x82   :  { %913 = vmatprep.mubr.bf16.mxu1 %v1312_v32  ;;  %1528 = vmatpush3.bf16.msra.mxu1 %v1662_v43 }
  0x83   :  { %1529 = vmatprep.subr.bf16.mxu1 %v1663_v44 }
  0x84   :  { %1558 = vmatpush3.bf16.msra.mxu0 %v1652_v25 }
  0x85   :  { %1559 = vmatprep.subr.bf16.mxu0 %v1653_v29 }
  0x86   :  { %1530 = vmatpush3.bf16.msra.mxu1 %v1664_v45  ;;  %v1377_v45 = vld [vmem:[%s1906_s5] ss:$0 sm:$0xff] }
  0x87   :  { %865 = vmatmul.mubr.bf16.gmra.mxu0 %v1309_v33  ;;  %1531 = vmatprep.subr.bf16.mxu1 %v1665_v46 }
  0x88   :  { %1560 = vmatpush3.bf16.msra.mxu0 %v1653_v29  ;;  %914 = vmatmul.mubr.bf16.gmra.mxu1 %v1311_v34 }
  0x89   :  { %1561 = vmatprep.subr.bf16.mxu0 %v1654_v35  ;;  %1571 = vmatprep.mubr.bf16.mxu0 %v1659_v36 }
  0x8a   :  { %1532 = vmatpush3.bf16.msra.mxu1 %v1666_v47 }
  0x8b   :  { %1533 = vmatprep.subr.bf16.mxu1 %v1667_v48 }
  0x8c   :  { %1562 = vmatpush3.bf16.msra.mxu0 %v1654_v35 }
  0x8d   :  { %1563 = vmatprep.subr.bf16.mxu0 %v1655_v37 }
  0x8e   :  { %1534 = vmatpush3.bf16.msra.mxu1 %v1668_v49 }
  0x8f   :  { %1535 = vmatprep.subr.bf16.mxu1 %v1669_v50 }
  0x90   :  { %1564 = vmatpush3.bf16.msra.mxu0 %v1655_v37 }
  0x91   :  { %1565 = vmatprep.subr.bf16.mxu0 %v1656_v38 }
  0x92   :  { %1536 = vmatpush3.bf16.msra.mxu1 %v1670_v51 }
  0x93   :  { %1537 = vmatprep.subr.bf16.mxu1 %v1671_v52 }
  0x94   :  { %1566 = vmatpush3.bf16.msra.mxu0 %v1656_v38 }
  0x95   :  { %1567 = vmatprep.subr.bf16.mxu0 %v1657_v39 }
  0x96   :  { %1538 = vmatpush3.bf16.msra.mxu1 %v1672_v53 }
  0x97   :  { %1539 = vmatprep.subr.bf16.mxu1 %v1673_v54  ;;  %v1296_v54 = vld [vmem:[%s1904_s3] ss:$0 sm:$0xff] }
  0x98   :  { %1568 = vmatpush3.bf16.msra.mxu0 %v1657_v39 }
  0x99   :  { %1569 = vmatprep.subr.bf16.mxu0 %v1658_v40 }
  0x9a   :  { %1540 = vmatpush3.bf16.msra.mxu1 %v1674_v55 }
  0x9b   :  { %1541 = vmatprep.subr.bf16.mxu1 %v1675_v56 }
  0x9c   :  { %1570 = vmatpush3.bf16.msra.mxu0 %v1658_v40 }
  0x9e   :  { %1542 = vmatpush3.bf16.msra.mxu1 %v1676_v57 }
  0x9f   :  { %1572 = vmatmul.mubr.bf16.vlgmr.msra.gmra.mxu0 %v1660_v41 }
 0x11f   :  { %v1421_v58 = vpop.f32.mrf.mxu0 }
 0x120   :  { %v1449_v60 = vpop.f32.mrf.mxu1 }
 0x121   :  { %v1422_v59 = vpop.f32.mrf.mxu0 }
 0x122   :  { %v1450_v62 = vpop.f32.mrf.mxu1  ;;  %v1423_v24 = vadd.f32 %v1422_v59, %v1421_v58 }
 0x123   :  { %v1424_v61 = vpop.f32.mrf.mxu0  ;;  %v1451_v25 = vadd.f32 %v1450_v62, %v1449_v60 }
 0x124   :  { %v1452_v1 = vpop.f32.mrf.mxu1 }
 0x125   :  { %v1425_v63 = vpop.f32.mrf.mxu0  ;;  %v810_v31 = vadd.f32 %v1451_v25, %v1423_v24 }
 0x126   :  { %v1453_v3 = vpop.f32.mrf.mxu1  ;;  %v1426_v21 = vadd.f32 %v1425_v63, %v1424_v61 }
 0x127   :  { %v1427_v0 = vpop.f32.mrf.mxu0  ;;  %v1454_v22 = vadd.f32 %v1453_v3, %v1452_v1 }
 0x128   :  { %v1455_v4 = vpop.f32.mrf.mxu1 }
 0x129   :  { %v1428_v2 = vpop.f32.mrf.mxu0  ;;  %v813_v28 = vadd.f32 %v1454_v22, %v1426_v21 }
 0x12a   :  { %v1456_v6 = vpop.f32.mrf.mxu1  ;;  %v1429_v41 = vadd.f32 %v1428_v2, %v1427_v0 }
 0x12b   :  { %v1430_v5 = vpop.f32.mrf.mxu0  ;;  %v1457_v42 = vadd.f32 %v1456_v6, %v1455_v4 }
 0x12c   :  { %v1458_v9 = vpop.f32.mrf.mxu1 }
 0x12d   :  { %v1431_v7 = vpop.f32.mrf.mxu0  ;;  %v818_v57 = vadd.f32 %v1457_v42, %v1429_v41 }
 0x12e   :  { %v1459_v11 = vpop.f32.mrf.mxu1  ;;  %v1432_v36 = vadd.f32 %v1431_v7, %v1430_v5 }
 0x12f   :  { %v1460_v37 = vadd.f32 %v1459_v11, %v1458_v9 }
 0x131   :  { %v821_v50 = vadd.f32 %v1460_v37, %v1432_v36 }
 0x13f   :  { %v1477_v8 = vpop.f32.mrf.mxu0 }
 0x140   :  { %v1505_v12 = vpop.f32.mrf.mxu1 }
 0x141   :  { %v1478_v10 = vpop.f32.mrf.mxu0 }
 0x142   :  { %v1506_v14 = vpop.f32.mrf.mxu1  ;;  %v1479_v29 = vadd.f32 %v1478_v10, %v1477_v8 }
 0x143   :  { %v1480_v13 = vpop.f32.mrf.mxu0  ;;  %v1507_v39 = vadd.f32 %v1506_v14, %v1505_v12 }
 0x144   :  { %v1508_v16 = vpop.f32.mrf.mxu1  ;;  %v859_v38 = vadd.f32 %v1479_v29, %v810_v31 }
 0x145   :  { %v1481_v15 = vpop.f32.mrf.mxu0 }
 0x146   :  { %v1509_v18 = vpop.f32.mrf.mxu1  ;;  %v1482_v26 = vadd.f32 %v1481_v15, %v1480_v13  ;;  %v908_v51 = vadd.f32 %v1507_v39, %v859_v38  ;;  %v1388_v13 = vld [vmem:[%s1908_s7] ss:$0 sm:$0xff]  ;;  %s1777_s7 = scalar_lea.vmem %s1283_s12, 512 }
 0x147   :  { %v1483_v17 = vpop.f32.mrf.mxu0  ;;  %v1510_v33 = vadd.f32 %v1509_v18, %v1508_v16  ;;  %p1778_p11 = scmp.ne.s32.totalorder %s1283_s12, %s1777_s7  ;;  %p1783_p13 = scmp.lt.s32.totalorder %s1777_s7, %s1777_s7 }
 0x148   :  { %v1511_v20 = vpop.f32.mrf.mxu1  ;;  %v862_v32 = vadd.f32 %v1482_v26, %v813_v28  ;;  %v922_v0 = vadd.f32 %v1296_v54, %v908_v51 }
 0x149   :  { %v1484_v19 = vpop.f32.mrf.mxu0  ;;  %p1784_p0 = por %p1783_p13, %p1782_p12 }
 0x14a   :  { %v1512_v27 = vpop.f32.mrf.mxu1  ;;  %v911_v43 = vadd.f32 %v1510_v33, %v862_v32  ;;  %v1485_v52 = vadd.f32 %v1484_v19, %v1483_v17 }
 0x14b   :  { %v1486_v23 = vpop.f32.mrf.mxu0  ;;  %v1513_v2 = vadd.f32 %v1512_v27, %v1511_v20  ;;  %p1785_p1 = pnand %p1784_p0, %p1778_p11 }
 0x14c   :  { %v1514_v35 = vpop.f32.mrf.mxu1  ;;  %v923_v58 = vadd.f32 %v1296_v54, %v911_v43  ;;  %v867_v1 = vadd.f32 %v1485_v52, %v818_v57 }
 0x14d   :  { %v1487_v30 = vpop.f32.mrf.mxu0 }
 0x14e   :  { %v1488_v44 = vadd.f32 %v1487_v30, %v1486_v23  ;;  %v1515_v47 = vpop.f32.mrf.mxu1  ;;  %v1085_v5 = vpack.c.bf16 %v923_v58, %v922_v0  ;;  %v916_v8 = vadd.f32 %v1513_v2, %v867_v1 }
 0x14f   :  { %v1516_v60 = vadd.f32 %v1515_v47, %v1514_v35 }
 0x150   :  { %v870_v59 = vadd.f32 %v1488_v44, %v821_v50  ;;  %v924_v10 = vadd.f32 %v1296_v54, %v916_v8 }
 0x152   :  { %v919_v6 = vadd.f32 %v1516_v60, %v870_v59 }
 0x154   :  { %v925_v9 = vadd.f32 %v1296_v54, %v919_v6 }
 0x156   :  { %v1087_v11 = vpack.c.bf16 %v925_v9, %v924_v10 }
 0x15f   :  { %v1573_v34 = vpop.f32.mrf.mxu0 }
 0x160   :  { %v1063_v55 = vadd.f32 %v1573_v34, %v1377_v45 }
 0x161   :  { %v1054_v40 = vpop.f32.mrf.mxu0 }
 0x162   :  { %v1055_v48 = vadd.f32 %v1377_v45, %v1054_v40  ;;  %v1071_v3 = vmax.f32 %v1063_v55, 0.0 }
 0x163   :  { %v1574_v46 = vpop.f32.mrf.mxu0 }
 0x164   :  { %v1066_v49 = vadd.f32 %v1574_v46, %v1377_v45  ;;  %v1069_v61 = vmax.f32 %v1055_v48, 0.0 }
 0x165   :  { %v1057_v53 = vpop.f32.mrf.mxu0 }
 0x166   :  { %v1058_v56 = vadd.f32 %v1377_v45, %v1057_v53  ;;  %v1072_v62 = vmax.f32 %v1066_v49, 0.0 }
 0x168   :  { %v1070_v63 = vmax.f32 %v1058_v56, 0.0  ;;  %v1088_v7 = vpack.c.bf16 %v1072_v62, %v1071_v3 }
 0x16a   :  { %v1086_v4 = vpack.c.bf16 %v1070_v63, %v1069_v61 }
 0x16c   :  { %1256 = vmatprep.mubr.bf16.mxu1 %v1086_v4 }
 0x16d   :  { %1257 = vmatmul.mubr.bf16.vlgmr.msra.gmra.mxu1 %v1085_v5 }
 0x16e   :  { %1264 = vmatprep.mubr.bf16.mxu1 %v1088_v7 }
 0x175   :  { %1265 = vmatmul.mubr.bf16.gmra.mxu1 %v1087_v11 }
 0x22d   :  { %v1543_v12 = vpop.f32.mrf.mxu1 }
 0x22f   :  { %v1544_v14 = vpop.f32.mrf.mxu1 }
 0x230   :  { %v1545_v15 = vadd.f32 %v1544_v14, %v1543_v12 }
 0x231   :  { %v1546_v16 = vpop.f32.mrf.mxu1 }
 0x232   :  { %v1259_v17 = vadd.f32 %v1545_v15, %v1388_v13 }
 0x233   :  { %v1547_v18 = vpop.f32.mrf.mxu1 }
 0x234   :  { %1273 = vst [vmem:[#allocation12] sm:$0xff] %v1259_v17  ;;  %v1548_v19 = vadd.f32 %v1547_v18, %v1546_v16 }
 0x235   :  { %v1549_v20 = vpop.f32.mrf.mxu1 }
 0x236   :  { %v1262_v21 = vadd.f32 %v1548_v19, %v1388_v13 }
 0x237   :  { %v1550_v22 = vpop.f32.mrf.mxu1 }
 0x238   :  { %1274 = vst [vmem:[#allocation12 + $0x8] sm:$0xff] %v1262_v21  ;;  %v1551_v23 = vadd.f32 %v1550_v22, %v1549_v20 }
 0x239   :  { %v1552_v24 = vpop.f32.mrf.mxu1 }
 0x23a   :  { %v1267_v25 = vadd.f32 %v1551_v23, %v1388_v13 }
 0x23b   :  { %v1553_v26 = vpop.f32.mrf.mxu1 }
 0x23c   :  { %1275 = vst [vmem:[#allocation12 + $0x10] sm:$0xff] %v1267_v25  ;;  %v1554_v27 = vadd.f32 %v1553_v26, %v1552_v24 }
 0x23e   :  { %v1270_v28 = vadd.f32 %v1554_v27, %v1388_v13 }
 0x240   :  { %1276 = vst [vmem:[#allocation12 + $0x18] sm:$0xff] %v1270_v28 }
 0x241   :  { %1788 = shalt.err (!%p1785_p1)
}
 0x242   :  { %s1815_s13 = smov 128   ;;  %s1816_s14 = smov 8  }
 0x243   :  { %1288 = dma.vmem_to_hbm [thread:$0]  %s1283_s12, 512, %s1909_s8, [#allocation5], %s1815_s13, %s1815_s13, %s1816_s14  }
 0x244   :  { %1803 = dma.done.wait [#allocation5], 512  }
 0x245   :  { %1804 = vsyncadd [#allocation5], 4294966784 }
 0x246   :  { %1292 = vsyncpa [#allocation4], 1 }
 0x247   :  { %1293 = vsyncpa [#allocation7], 1 }
 0x248   :  { %1294 = vsyncpa [#allocation10], 1 }
 0x249   :  { %1295 = vsyncpa [#allocation5], 1 }

</bundles_post_ra>
